<compile_context>
chip_gen: v7x
topology: tpu7x:2x2x1
jax: 0.10.0
libtpu: 0.0.40
codegen_flags: <defaults>
</compile_context>

<pallas_src>
import functools

import jax
import jax.numpy as jnp
from jax.experimental import pallas as pl
from jax.experimental.pallas import tpu as pltpu

_EPS = 1e-5
_F32 = jnp.float32
_BF16 = jnp.bfloat16


def _pick_batches_per_tile(B, L, Lo, target_rows):
    """Largest nb dividing B whose tile (nb*L rows) stays near `target_rows` while
    keeping every blocked array 16-row (bf16) / 8-row (f32) aligned.  Falls back
    to one tile spanning everything (full-array blocks are exempt from the
    (8, 128) block-shape rule)."""
    candidates = [nb for nb in range(1, B + 1)
                  if B % nb == 0
                  and (nb * L) % 16 == 0      # bf16-staged activation tiles
                  and (nb * Lo) % 8 == 0      # f32 transform-output tiles
                  and nb * L <= max(target_rows, L)]
    return max(candidates) if candidates else B


def _conv3_same(h, w_ref, bias, pos, L, R):
    """Fused 3-tap 'same' conv on an (R, C) tile of whole batches: +-1 taps via
    XLU sublane rolls + batch-edge masks, fused into ONE bf16 MXU matmul with
    contraction depth 3*C (f32 accumulate)."""
    has_left = (pos != 0).astype(_F32)
    has_right = (pos != L - 1).astype(_F32)
    left = pltpu.roll(h, shift=1, axis=0) * has_left            # h[l-1], 0 at l==0
    right = pltpu.roll(h, shift=R - 1, axis=0) * has_right      # h[l+1], 0 at l==L-1
    h3 = jnp.concatenate([left, h, right], axis=1).astype(_BF16)  # (R, 3*C)
    return jnp.dot(h3, w_ref[...], preferred_element_type=_F32) + bias


def _write_stats(h, st_ref):
    """Single-traversal per-tile BN partials: one read of h yields both the sum
    and the sum-of-squares (variance is finalized later as E[x^2] - E[x]^2)."""
    st_ref[...] = jnp.concatenate(
        [jnp.sum(h, axis=0, keepdims=True),
         jnp.sum(h * h, axis=0, keepdims=True)], axis=0)[None, :, :]


def _conv1_kernel(x_ref, w1_ref, b1_ref, h1_ref, st_ref, *, L, R):
    """Pass 1: h1_pre = relu(conv1(x)) plus per-tile BN1 partial statistics."""
    pos = jax.lax.broadcasted_iota(jnp.int32, (R, 1), 0) % L
    x = x_ref[...].astype(_F32)
    h = jnp.maximum(_conv3_same(x, w1_ref, b1_ref[0:1, :], pos, L, R), 0.0)
    h1_ref[...] = h.astype(h1_ref.dtype)
    _write_stats(h, st_ref)


def _conv2_kernel(h1_ref, t_ref, wt_ref, w2_ref, v_ref, h2_ref, st_ref,
                  *, L, R, nb, Cout):
    """Pass 2: bnorm1 -> + time embedding -> h2_pre = relu(conv2(.)) + BN2 partials."""
    scale1, shift1 = v_ref[0:1, :], v_ref[1:2, :]
    bt, b2 = v_ref[2:3, :], v_ref[3:4, :]

    h = h1_ref[...].astype(_F32) * scale1 + shift1            # folded bnorm1

    # time_emb = relu(Linear(t)) for this tile's nb batches, broadcast over L.
    te = jnp.dot(t_ref[0].astype(_BF16), wt_ref[...], preferred_element_type=_F32) + bt
    te = jnp.maximum(te, 0.0)                                  # (nb, Cout)
    if nb == 1:
        te_full = jnp.broadcast_to(te, (R, Cout))              # single row broadcast
    else:
        # nb is a small static tile parameter (<= target_rows/L): a handful of
        # sublane broadcasts per tile, no longer O(global batch) as in v2.
        te_full = jnp.concatenate(
            [jnp.broadcast_to(te[b:b + 1, :], (L, Cout)) for b in range(nb)], axis=0)
    h = h + te_full

    pos = jax.lax.broadcasted_iota(jnp.int32, (R, 1), 0) % L
    h2 = jnp.maximum(_conv3_same(h, w2_ref, b2, pos, L, R), 0.0)
    h2_ref[...] = h2
    _write_stats(h2, st_ref)


def _transform_kernel(h2_ref, w3_ref, v_ref, out_ref, *, Lo, Ro):
    """Pass 3: bnorm2 -> Conv1d(Cout, Cout, 3, stride=2, padding=1).

    out[b, j] = W0 @ h2[2j-1] + W1 @ h2[2j] + W2 @ h2[2j+1]   (h2[-1] = 0).
    Even/odd taps come from strided pl.ds loads straight off the incoming f32
    tile (no scratch copy), are normalized, and feed one fused matmul."""
    scale2, shift2, b3 = v_ref[0:1, :], v_ref[1:2, :], v_ref[2:3, :]
    even = h2_ref[pl.ds(0, Ro, stride=2), :] * scale2 + shift2    # h2[2j]
    odd = h2_ref[pl.ds(1, Ro, stride=2), :] * scale2 + shift2     # h2[2j+1]
    jo = jax.lax.broadcasted_iota(jnp.int32, (Ro, 1), 0) % Lo
    prev = pltpu.roll(odd, shift=1, axis=0) * (jo != 0).astype(_F32)  # h2[2j-1]
    h3 = jnp.concatenate([prev, even, odd], axis=1).astype(_BF16)     # (Ro, 3*C)
    out_ref[...] = (jnp.dot(h3, w3_ref[...], preferred_element_type=_F32)
                    + b3).astype(out_ref.dtype)


def _compiler_params(block_bytes, resident_bytes):
    # Scoped-VMEM limit derived from the tile footprint (double-buffered blocks
    # + resident weights + headroom), capped well under v7x's 64 MiB physical VMEM.
    limit = int(min(48 << 20, max(4 << 20, 4 * block_bytes + resident_bytes + (2 << 20))))
    return pltpu.CompilerParams(dimension_semantics=("parallel",),
                                vmem_limit_bytes=limit)


def block_forward(x, t, params, *, target_rows_per_tile=512):
    """x: (B, in_ch, L) NCL float32; t: (B, time_emb_dim). Returns (B, out_ch, Lo)."""
    B, Cin, L = x.shape
    E = t.shape[1]
    Cout = params["w1"].shape[0]
    assert L % 2 == 0, "kernel assumes an even sequence length"
    Lo = (L - 1) // 2 + 1
    BL, BLo = B * L, B * Lo

    nb = _pick_batches_per_tile(B, L, Lo, target_rows_per_tile)
    T = B // nb
    R, Ro = nb * L, nb * Lo

    # NCL -> (B*L, Cin) channels-last; activations staged in bf16 (half the HBM
    # traffic, bf16-native MXU); BN statistics/normalization stay f32.
    x2d = jnp.transpose(x, (0, 2, 1)).reshape(BL, Cin).astype(_BF16)
    t3 = t.reshape(T, nb, E).astype(_F32)

    def stack_taps(w):  # (Cout, C, 3) -> (3*C, Cout), tap-major rows, bf16
        return jnp.concatenate([w[:, :, k].T for k in range(3)], axis=0).astype(_BF16)

    w1s = stack_taps(params["w1"])
    w2s = stack_taps(params["w2"])
    w3s = stack_taps(params["w3"])
    wtT = params["wt"].T.astype(_BF16)                         # (E, Cout)

    def row_spec(rows, width):
        return pl.BlockSpec((rows, width), lambda i: (i, 0))

    def resident(shape):
        # Grid-invariant operand: constant index_map -> DMA'd once, stays resident.
        return pl.BlockSpec(shape, lambda i: (0,) * len(shape))

    stats_spec = pl.BlockSpec((1, 2, Cout), lambda i: (i, 0, 0))
    stats_shape = jax.ShapeDtypeStruct((T, 2, Cout), _F32)

    def bn_fold(stats, gamma, beta):
        # Tiny per-channel finalize of the two-pass BN (training mode, biased var).
        s = jnp.sum(stats[:, 0, :], axis=0)
        ss = jnp.sum(stats[:, 1, :], axis=0)
        mean = s / BL
        var = ss / BL - mean * mean
        scale = gamma * jax.lax.rsqrt(var + _EPS)
        return scale, beta - mean * scale

    # ---- pass 1: h1_pre = relu(conv1(x)); per-tile BN1 partial stats ----
    h1_pre, st1 = pl.pallas_call(
        functools.partial(_conv1_kernel, L=L, R=R),
        grid=(T,),
        in_specs=[row_spec(R, Cin), resident((3 * Cin, Cout)), resident((1, Cout))],
        out_specs=(row_spec(R, Cout), stats_spec),
        out_shape=(jax.ShapeDtypeStruct((BL, Cout), _BF16), stats_shape),
        compiler_params=_compiler_params(
            2 * R * (Cin + Cout) + 8 * Cout, 6 * Cin * Cout + 4 * Cout),
        cost_estimate=pl.CostEstimate(
            flops=2 * BL * 3 * Cin * Cout, transcendentals=0,
            bytes_accessed=2 * BL * (Cin + Cout) + 6 * Cin * Cout + 8 * T * Cout),
    )(x2d, w1s, params["b1"].reshape(1, Cout).astype(_F32))

    scale1, shift1 = bn_fold(st1, params["g1"], params["beta1"])
    vecs2 = jnp.stack([scale1, shift1, params["bt"], params["b2"]], axis=0).astype(_F32)

    # ---- pass 2: bnorm1 -> + time_emb -> h2_pre = relu(conv2(.)); BN2 stats ----
    # h2_pre stays f32: pass 3 reads it with sublane-strided loads, which do not
    # mix with bf16's packed-sublane layout.
    h2_pre, st2 = pl.pallas_call(
        functools.partial(_conv2_kernel, L=L, R=R, nb=nb, Cout=Cout),
        grid=(T,),
        in_specs=[row_spec(R, Cout),
                  pl.BlockSpec((1, nb, E), lambda i: (i, 0, 0)),
                  resident((E, Cout)),
                  resident((3 * Cout, Cout)),
                  resident((4, Cout))],
        out_specs=(row_spec(R, Cout), stats_spec),
        out_shape=(jax.ShapeDtypeStruct((BL, Cout), _F32), stats_shape),
        compiler_params=_compiler_params(
            6 * R * Cout + 4 * nb * E + 8 * Cout,
            2 * (E + 3 * Cout) * Cout + 16 * Cout),
        cost_estimate=pl.CostEstimate(
            flops=2 * BL * 3 * Cout * Cout + 2 * B * E * Cout, transcendentals=0,
            bytes_accessed=6 * BL * Cout + 4 * B * E + 2 * (E + 3 * Cout) * Cout
                           + 8 * T * Cout),
    )(h1_pre, t3, wtT, w2s, vecs2)

    scale2, shift2 = bn_fold(st2, params["g2"], params["beta2"])
    vecs3 = jnp.stack([scale2, shift2, params["b3"]], axis=0).astype(_F32)

    # ---- pass 3: bnorm2 -> stride-2 transform conv ----
    out2d = pl.pallas_call(
        functools.partial(_transform_kernel, Lo=Lo, Ro=Ro),
        grid=(T,),
        in_specs=[row_spec(R, Cout), resident((3 * Cout, Cout)), resident((3, Cout))],
        out_specs=row_spec(Ro, Cout),
        out_shape=jax.ShapeDtypeStruct((BLo, Cout), _F32),
        compiler_params=_compiler_params(
            4 * (R + Ro) * Cout, 6 * Cout * Cout + 12 * Cout),
        cost_estimate=pl.CostEstimate(
            flops=2 * BLo * 3 * Cout * Cout, transcendentals=0,
            bytes_accessed=4 * (BL + BLo) * Cout + 6 * Cout * Cout),
    )(h2_pre, w3s, vecs3)

    # (B*Lo, Cout) -> (B, Cout, Lo) to match PyTorch NCL output.
    return jnp.transpose(out2d.reshape(B, Lo, Cout), (0, 2, 1))


def block_forward_ref(x, t, p):
    """Pure-JAX f32 reference matching the PyTorch forward (training-mode BN)."""
    def conv1d(h, w, b, stride=1, pad=1):
        y = jax.lax.conv_general_dilated(
            h, w, window_strides=(stride,), padding=[(pad, pad)],
            dimension_numbers=("NCH", "OIH", "NCH"))
        return y + b[None, :, None]

    def bn(h, g, b):
        mean = jnp.mean(h, axis=(0, 2), keepdims=True)
        var = jnp.mean((h - mean) ** 2, axis=(0, 2), keepdims=True)
        return g[None, :, None] * (h - mean) / jnp.sqrt(var + _EPS) + b[None, :, None]

    h = bn(jax.nn.relu(conv1d(x, p["w1"], p["b1"])), p["g1"], p["beta1"])
    te = jax.nn.relu(t @ p["wt"].T + p["bt"])
    h = h + te[:, :, None]
    h = bn(jax.nn.relu(conv1d(h, p["w2"], p["b2"])), p["g2"], p["beta2"])
    return conv1d(h, p["w3"], p["b3"], stride=2, pad=1)


if __name__ == "__main__":
    B, Cin, Cout, L, E = 2, 4, 8, 16, 32  # in_ch=4, out_ch=8, time_emb_dim=32
    key = jax.random.PRNGKey(0)
    ks = jax.random.split(key, 14)
    p = {
        "w1": 0.1 * jax.random.normal(ks[0], (Cout, Cin, 3), jnp.float32),
        "b1": 0.1 * jax.random.normal(ks[1], (Cout,), jnp.float32),
        "g1": 1.0 + 0.1 * jax.random.normal(ks[2], (Cout,), jnp.float32),
        "beta1": 0.1 * jax.random.normal(ks[3], (Cout,), jnp.float32),
        "wt": 0.1 * jax.random.normal(ks[4], (Cout, E), jnp.float32),
        "bt": 0.1 * jax.random.normal(ks[5], (Cout,), jnp.float32),
        "w2": 0.1 * jax.random.normal(ks[6], (Cout, Cout, 3), jnp.float32),
        "b2": 0.1 * jax.random.normal(ks[7], (Cout,), jnp.float32),
        "g2": 1.0 + 0.1 * jax.random.normal(ks[8], (Cout,), jnp.float32),
        "beta2": 0.1 * jax.random.normal(ks[9], (Cout,), jnp.float32),
        "w3": 0.1 * jax.random.normal(ks[10], (Cout, Cout, 3), jnp.float32),
        "b3": 0.1 * jax.random.normal(ks[11], (Cout,), jnp.float32),
    }
    x = jax.random.normal(ks[12], (B, Cin, L), jnp.float32)
    t = jax.random.normal(ks[13], (B, E), jnp.float32)

    ref = jax.block_until_ready(block_forward_ref(x, t, p))

    # Exercise both tiling configurations at the toy shapes:
    #   512 -> two batches per tile (single grid step), 16 -> one batch per tile
    #   (two grid steps; cross-tile BN partial-stat reduction + resident weights).
    for rows in (512, 16):
        fwd = jax.jit(functools.partial(block_forward, target_rows_per_tile=rows))
        out = jax.block_until_ready(fwd(x, t, p))
        assert out.shape == (B, Cout, (L - 1) // 2 + 1), out.shape
        err = float(jnp.max(jnp.abs(out - ref)))
        # bf16 MXU operands + bf16-staged h1 -> relaxed tolerance vs f32 reference.
        assert jnp.allclose(out, ref, atol=5e-2, rtol=5e-2), f"max abs err {err}"

    print("KERNEL_OK")
</pallas_src>

<mosaic_0001>
module attributes {stable_mosaic.version = 11 : i64} {
  func.func @_conv1_kernel(%arg0: i32, %arg1: memref<32x4xbf16, #tpu.memory_space<vmem>>, %arg2: memref<12x8xbf16, #tpu.memory_space<vmem>>, %arg3: memref<1x8xf32, #tpu.memory_space<vmem>>, %arg4: memref<32x8xbf16, #tpu.memory_space<vmem>>, %arg5: memref<1x2x8xf32, #tpu.memory_space<vmem>>) attributes {dimension_semantics = [#tpu.dimension_semantics<parallel>], iteration_bounds = array<i64: 1>, scalar_prefetch = 0 : i64, scratch_operands = 0 : i64, tpu.core_type = #tpu.core_type<tc>, window_params = [{transform_indices = @transform_0, window_bounds = array<i64: 32, 4>}, {pipeline_mode = #tpu.pipeline_mode<synchronous>, transform_indices = @transform_1, window_bounds = array<i64: 12, 8>}, {pipeline_mode = #tpu.pipeline_mode<synchronous>, transform_indices = @transform_2, window_bounds = array<i64: 1, 8>}, {transform_indices = @transform_3, window_bounds = array<i64: 32, 8>}, {transform_indices = @transform_4, window_bounds = array<i64: 1, 2, 8>}]} {
    %0 = tpu.iota {dimensions = array<i32: 0>} : vector<32x1xi32>
    %c16_i32 = arith.constant 16 : i32
    %c0_i32 = arith.constant 0 : i32
    %1 = arith.cmpi eq, %c16_i32, %c0_i32 : i32
    %c1_i32 = arith.constant 1 : i32
    %2 = arith.select %1, %c1_i32, %c16_i32 : i32
    %3 = vector.broadcast %2 : i32 to vector<32x1xi32>
    %4 = arith.remsi %0, %3 : vector<32x1xi32>
    %c0_i32_0 = arith.constant 0 : i32
    %5 = vector.broadcast %c0_i32_0 : i32 to vector<32x1xi32>
    %6 = arith.cmpi ne, %4, %5 : vector<32x1xi32>
    %c0_i32_1 = arith.constant 0 : i32
    %7 = vector.broadcast %c0_i32_1 : i32 to vector<32x1xi32>
    %8 = arith.cmpi slt, %4, %7 : vector<32x1xi32>
    %c0_i32_2 = arith.constant 0 : i32
    %9 = arith.cmpi slt, %2, %c0_i32_2 : i32
    %10 = vector.broadcast %9 : i1 to vector<32x1xi1>
    %11 = vector.broadcast %10 : vector<32x1xi1> to vector<32x1xi1>
    %12 = arith.xori %8, %11 : vector<32x1xi1>
    %13 = arith.andi %12, %6 : vector<32x1xi1>
    %14 = vector.broadcast %2 : i32 to vector<32x1xi32>
    %15 = arith.addi %4, %14 : vector<32x1xi32>
    %16 = arith.select %13, %15, %4 : vector<32x1xi1>, vector<32x1xi32>
    %c0 = arith.constant 0 : index
    %c0_3 = arith.constant 0 : index
    %17 = vector.load %arg1[%c0, %c0_3] : memref<32x4xbf16, #tpu.memory_space<vmem>>, vector<32x4xbf16>
    %18 = arith.extf %17 : vector<32x4xbf16> to vector<32x4xf32>
    %c0_4 = arith.constant 0 : index
    %c0_5 = arith.constant 0 : index
    %19 = vector.load %arg3[%c0_4, %c0_5] : memref<1x8xf32, #tpu.memory_space<vmem>>, vector<1x8xf32>
    %c0_i32_6 = arith.constant 0 : i32
    %20 = vector.broadcast %c0_i32_6 : i32 to vector<32x1xi32>
    %21 = arith.cmpi ne, %16, %20 : vector<32x1xi32>
    %22 = arith.extui %21 : vector<32x1xi1> to vector<32x1xi32>
    %23 = arith.sitofp %22 : vector<32x1xi32> to vector<32x1xf32>
    %c15_i32 = arith.constant 15 : i32
    %24 = vector.broadcast %c15_i32 : i32 to vector<32x1xi32>
    %25 = arith.cmpi ne, %16, %24 : vector<32x1xi32>
    %26 = arith.extui %25 : vector<32x1xi1> to vector<32x1xi32>
    %27 = arith.sitofp %26 : vector<32x1xi32> to vector<32x1xf32>
    %c1_i32_7 = arith.constant 1 : i32
    %28 = tpu.dynamic_rotate %18 by %c1_i32_7 dim 0 : vector<32x4xf32>, i32 -> vector<32x4xf32>
    %29 = vector.broadcast %23 : vector<32x1xf32> to vector<32x4xf32>
    %30 = arith.mulf %28, %29 : vector<32x4xf32>
    %c31_i32 = arith.constant 31 : i32
    %31 = tpu.dynamic_rotate %18 by %c31_i32 dim 0 : vector<32x4xf32>, i32 -> vector<32x4xf32>
    %32 = vector.broadcast %27 : vector<32x1xf32> to vector<32x4xf32>
    %33 = arith.mulf %31, %32 : vector<32x4xf32>
    %34 = tpu.concatenate %30, %18, %33 in 1 : vector<32x4xf32>, vector<32x4xf32>, vector<32x4xf32> -> vector<32x12xf32>
    %35 = arith.truncf %34 : vector<32x12xf32> to vector<32x12xbf16>
    %c0_8 = arith.constant 0 : index
    %c0_9 = arith.constant 0 : index
    %36 = vector.load %arg2[%c0_8, %c0_9] : memref<12x8xbf16, #tpu.memory_space<vmem>>, vector<12x8xbf16>
    %cst = arith.constant dense<0.000000e+00> : vector<32x8xf32>
    %37 = tpu.matmul %35, %36, %cst {dimension_numbers = #tpu.dot_dimension_numbers<[1], [0], [0], [1], [0, 0, 1, 1], [], []>} : vector<32x12xbf16>, vector<12x8xbf16>, vector<32x8xf32> -> vector<32x8xf32>
    %38 = vector.broadcast %19 : vector<1x8xf32> to vector<32x8xf32>
    %39 = arith.addf %37, %38 : vector<32x8xf32>
    %cst_10 = arith.constant 0.000000e+00 : f32
    %40 = vector.broadcast %cst_10 : f32 to vector<32x8xf32>
    %41 = arith.maximumf %39, %40 : vector<32x8xf32>
    %42 = arith.truncf %41 : vector<32x8xf32> to vector<32x8xbf16>
    %c0_11 = arith.constant 0 : index
    %c0_12 = arith.constant 0 : index
    %43 = vector.load %arg4[%c0_11, %c0_12] : memref<32x8xbf16, #tpu.memory_space<vmem>>, vector<32x8xbf16>
    tpu.vector_store %arg4[%c0_11, %c0_12], %42 {strides = array<i32>} : memref<32x8xbf16, #tpu.memory_space<vmem>>, vector<32x8xbf16>,
    %cst_13 = arith.constant dense<0.000000e+00> : vector<8xf32>
    %44 = vector.multi_reduction <add>, %41, %cst_13 [0] : vector<32x8xf32> to vector<8xf32>
    %45 = vector.shape_cast %44 : vector<8xf32> to vector<1x8xf32>
    %46 = arith.mulf %41, %41 : vector<32x8xf32>
    %cst_14 = arith.constant dense<0.000000e+00> : vector<8xf32>
    %47 = vector.multi_reduction <add>, %46, %cst_14 [0] : vector<32x8xf32> to vector<8xf32>
    %48 = vector.shape_cast %47 : vector<8xf32> to vector<1x8xf32>
    %49 = tpu.concatenate %45, %48 in 0 : vector<1x8xf32>, vector<1x8xf32> -> vector<2x8xf32>
    %50 = vector.shape_cast %49 : vector<2x8xf32> to vector<1x2x8xf32>
    %c0_15 = arith.constant 0 : index
    %c0_16 = arith.constant 0 : index
    %c0_17 = arith.constant 0 : index
    %51 = vector.load %arg5[%c0_15, %c0_16, %c0_17] : memref<1x2x8xf32, #tpu.memory_space<vmem>>, vector<1x2x8xf32>
    tpu.vector_store %arg5[%c0_15, %c0_16, %c0_17], %50 {strides = array<i32>} : memref<1x2x8xf32, #tpu.memory_space<vmem>>, vector<1x2x8xf32>,
    return
  }
  func.func @transform_0(%arg0: i32) -> (i32, i32) {
    %c0_i32 = arith.constant 0 : i32
    %c0_i32_0 = arith.constant 0 : i32
    return %arg0, %c0_i32 : i32, i32
  }
  func.func @transform_1(%arg0: i32) -> (i32, i32) {
    %c0_i32 = arith.constant 0 : i32
    %c0_i32_0 = arith.constant 0 : i32
    %c0_i32_1 = arith.constant 0 : i32
    return %c0_i32, %c0_i32_0 : i32, i32
  }
  func.func @transform_2(%arg0: i32) -> (i32, i32) {
    %c0_i32 = arith.constant 0 : i32
    %c0_i32_0 = arith.constant 0 : i32
    %c0_i32_1 = arith.constant 0 : i32
    return %c0_i32, %c0_i32_0 : i32, i32
  }
  func.func @transform_3(%arg0: i32) -> (i32, i32) {
    %c0_i32 = arith.constant 0 : i32
    %c0_i32_0 = arith.constant 0 : i32
    return %arg0, %c0_i32 : i32, i32
  }
  func.func @transform_4(%arg0: i32) -> (i32, i32, i32) {
    %c0_i32 = arith.constant 0 : i32
    %c0_i32_0 = arith.constant 0 : i32
    %c0_i32_1 = arith.constant 0 : i32
    return %arg0, %c0_i32, %c0_i32_0 : i32, i32, i32
  }
}

module attributes {stable_mosaic.version = 11 : i64} {
  func.func @_conv2_kernel(%arg0: i32, %arg1: memref<32x8xbf16, #tpu.memory_space<vmem>>, %arg2: memref<1x2x32xf32, #tpu.memory_space<vmem>>, %arg3: memref<32x8xbf16, #tpu.memory_space<vmem>>, %arg4: memref<24x8xbf16, #tpu.memory_space<vmem>>, %arg5: memref<4x8xf32, #tpu.memory_space<vmem>>, %arg6: memref<32x8xf32, #tpu.memory_space<vmem>>, %arg7: memref<1x2x8xf32, #tpu.memory_space<vmem>>) attributes {dimension_semantics = [#tpu.dimension_semantics<parallel>], iteration_bounds = array<i64: 1>, scalar_prefetch = 0 : i64, scratch_operands = 0 : i64, tpu.core_type = #tpu.core_type<tc>, window_params = [{transform_indices = @transform_0, window_bounds = array<i64: 32, 8>}, {transform_indices = @transform_1, window_bounds = array<i64: 1, 2, 32>}, {pipeline_mode = #tpu.pipeline_mode<synchronous>, transform_indices = @transform_2, window_bounds = array<i64: 32, 8>}, {pipeline_mode = #tpu.pipeline_mode<synchronous>, transform_indices = @transform_3, window_bounds = array<i64: 24, 8>}, {pipeline_mode = #tpu.pipeline_mode<synchronous>, transform_indices = @transform_4, window_bounds = array<i64: 4, 8>}, {transform_indices = @transform_5, window_bounds = array<i64: 32, 8>}, {transform_indices = @transform_6, window_bounds = array<i64: 1, 2, 8>}]} {
    %c0 = arith.constant 0 : index
    %c0_0 = arith.constant 0 : index
    %0 = vector.load %arg5[%c0, %c0_0] : memref<4x8xf32, #tpu.memory_space<vmem>>, vector<1x8xf32>
    %c1 = arith.constant 1 : index
    %c0_1 = arith.constant 0 : index
    %1 = vector.load %arg5[%c1, %c0_1] : memref<4x8xf32, #tpu.memory_space<vmem>>, vector<1x8xf32>
    %c2 = arith.constant 2 : index
    %c0_2 = arith.constant 0 : index
    %2 = vector.load %arg5[%c2, %c0_2] : memref<4x8xf32, #tpu.memory_space<vmem>>, vector<1x8xf32>
    %c3 = arith.constant 3 : index
    %c0_3 = arith.constant 0 : index
    %3 = vector.load %arg5[%c3, %c0_3] : memref<4x8xf32, #tpu.memory_space<vmem>>, vector<1x8xf32>
    %c0_4 = arith.constant 0 : index
    %c0_5 = arith.constant 0 : index
    %4 = vector.load %arg1[%c0_4, %c0_5] : memref<32x8xbf16, #tpu.memory_space<vmem>>, vector<32x8xbf16>
    %5 = arith.extf %4 : vector<32x8xbf16> to vector<32x8xf32>
    %6 = vector.broadcast %0 : vector<1x8xf32> to vector<32x8xf32>
    %7 = arith.mulf %5, %6 : vector<32x8xf32>
    %8 = vector.broadcast %1 : vector<1x8xf32> to vector<32x8xf32>
    %9 = arith.addf %7, %8 : vector<32x8xf32>
    %c0_6 = arith.constant 0 : index
    %c0_7 = arith.constant 0 : index
    %c0_8 = arith.constant 0 : index
    %10 = vector.load %arg2[%c0_6, %c0_7, %c0_8] : memref<1x2x32xf32, #tpu.memory_space<vmem>>, vector<1x2x32xf32>
    %11 = vector.shape_cast %10 : vector<1x2x32xf32> to vector<2x32xf32>
    %12 = arith.truncf %11 : vector<2x32xf32> to vector<2x32xbf16>
    %c0_9 = arith.constant 0 : index
    %c0_10 = arith.constant 0 : index
    %13 = vector.load %arg3[%c0_9, %c0_10] : memref<32x8xbf16, #tpu.memory_space<vmem>>, vector<32x8xbf16>
    %cst = arith.constant dense<0.000000e+00> : vector<2x8xf32>
    %14 = tpu.matmul %12, %13, %cst {dimension_numbers = #tpu.dot_dimension_numbers<[1], [0], [0], [1], [0, 0, 1, 1], [], []>} : vector<2x32xbf16>, vector<32x8xbf16>, vector<2x8xf32> -> vector<2x8xf32>
    %15 = vector.broadcast %2 : vector<1x8xf32> to vector<2x8xf32>
    %16 = arith.addf %14, %15 : vector<2x8xf32>
    %cst_11 = arith.constant 0.000000e+00 : f32
    %17 = vector.broadcast %cst_11 : f32 to vector<2x8xf32>
    %18 = arith.maximumf %16, %17 : vector<2x8xf32>
    %19 = vector.extract_strided_slice %18 {offsets = [0, 0], sizes = [1, 8], strides = [1, 1]} : vector<2x8xf32> to vector<1x8xf32>
    %20 = vector.shape_cast %19 : vector<1x8xf32> to vector<1x8xf32>
    %21 = vector.broadcast %20 : vector<1x8xf32> to vector<16x8xf32>
    %22 = vector.extract_strided_slice %18 {offsets = [1, 0], sizes = [1, 8], strides = [1, 1]} : vector<2x8xf32> to vector<1x8xf32>
    %23 = vector.shape_cast %22 : vector<1x8xf32> to vector<1x8xf32>
    %24 = vector.broadcast %23 : vector<1x8xf32> to vector<16x8xf32>
    %25 = tpu.concatenate %21, %24 in 0 : vector<16x8xf32>, vector<16x8xf32> -> vector<32x8xf32>
    %26 = arith.addf %9, %25 : vector<32x8xf32>
    %27 = tpu.iota {dimensions = array<i32: 0>} : vector<32x1xi32>
    %c16_i32 = arith.constant 16 : i32
    %c0_i32 = arith.constant 0 : i32
    %28 = arith.cmpi eq, %c16_i32, %c0_i32 : i32
    %c1_i32 = arith.constant 1 : i32
    %29 = arith.select %28, %c1_i32, %c16_i32 : i32
    %30 = vector.broadcast %29 : i32 to vector<32x1xi32>
    %31 = arith.remsi %27, %30 : vector<32x1xi32>
    %c0_i32_12 = arith.constant 0 : i32
    %32 = vector.broadcast %c0_i32_12 : i32 to vector<32x1xi32>
    %33 = arith.cmpi ne, %31, %32 : vector<32x1xi32>
    %c0_i32_13 = arith.constant 0 : i32
    %34 = vector.broadcast %c0_i32_13 : i32 to vector<32x1xi32>
    %35 = arith.cmpi slt, %31, %34 : vector<32x1xi32>
    %c0_i32_14 = arith.constant 0 : i32
    %36 = arith.cmpi slt, %29, %c0_i32_14 : i32
    %37 = vector.broadcast %36 : i1 to vector<32x1xi1>
    %38 = vector.broadcast %37 : vector<32x1xi1> to vector<32x1xi1>
    %39 = arith.xori %35, %38 : vector<32x1xi1>
    %40 = arith.andi %39, %33 : vector<32x1xi1>
    %41 = vector.broadcast %29 : i32 to vector<32x1xi32>
    %42 = arith.addi %31, %41 : vector<32x1xi32>
    %43 = arith.select %40, %42, %31 : vector<32x1xi1>, vector<32x1xi32>
    %c0_i32_15 = arith.constant 0 : i32
    %44 = vector.broadcast %c0_i32_15 : i32 to vector<32x1xi32>
    %45 = arith.cmpi ne, %43, %44 : vector<32x1xi32>
    %46 = arith.extui %45 : vector<32x1xi1> to vector<32x1xi32>
    %47 = arith.sitofp %46 : vector<32x1xi32> to vector<32x1xf32>
    %c15_i32 = arith.constant 15 : i32
    %48 = vector.broadcast %c15_i32 : i32 to vector<32x1xi32>
    %49 = arith.cmpi ne, %43, %48 : vector<32x1xi32>
    %50 = arith.extui %49 : vector<32x1xi1> to vector<32x1xi32>
    %51 = arith.sitofp %50 : vector<32x1xi32> to vector<32x1xf32>
    %c1_i32_16 = arith.constant 1 : i32
    %52 = tpu.dynamic_rotate %26 by %c1_i32_16 dim 0 : vector<32x8xf32>, i32 -> vector<32x8xf32>
    %53 = vector.broadcast %47 : vector<32x1xf32> to vector<32x8xf32>
    %54 = arith.mulf %52, %53 : vector<32x8xf32>
    %c31_i32 = arith.constant 31 : i32
    %55 = tpu.dynamic_rotate %26 by %c31_i32 dim 0 : vector<32x8xf32>, i32 -> vector<32x8xf32>
    %56 = vector.broadcast %51 : vector<32x1xf32> to vector<32x8xf32>
    %57 = arith.mulf %55, %56 : vector<32x8xf32>
    %58 = tpu.concatenate %54, %26, %57 in 1 : vector<32x8xf32>, vector<32x8xf32>, vector<32x8xf32> -> vector<32x24xf32>
    %59 = arith.truncf %58 : vector<32x24xf32> to vector<32x24xbf16>
    %c0_17 = arith.constant 0 : index
    %c0_18 = arith.constant 0 : index
    %60 = vector.load %arg4[%c0_17, %c0_18] : memref<24x8xbf16, #tpu.memory_space<vmem>>, vector<24x8xbf16>
    %cst_19 = arith.constant dense<0.000000e+00> : vector<32x8xf32>
    %61 = tpu.matmul %59, %60, %cst_19 {dimension_numbers = #tpu.dot_dimension_numbers<[1], [0], [0], [1], [0, 0, 1, 1], [], []>} : vector<32x24xbf16>, vector<24x8xbf16>, vector<32x8xf32> -> vector<32x8xf32>
    %62 = vector.broadcast %3 : vector<1x8xf32> to vector<32x8xf32>
    %63 = arith.addf %61, %62 : vector<32x8xf32>
    %cst_20 = arith.constant 0.000000e+00 : f32
    %64 = vector.broadcast %cst_20 : f32 to vector<32x8xf32>
    %65 = arith.maximumf %63, %64 : vector<32x8xf32>
    %c0_21 = arith.constant 0 : index
    %c0_22 = arith.constant 0 : index
    %66 = vector.load %arg6[%c0_21, %c0_22] : memref<32x8xf32, #tpu.memory_space<vmem>>, vector<32x8xf32>
    tpu.vector_store %arg6[%c0_21, %c0_22], %65 {strides = array<i32>} : memref<32x8xf32, #tpu.memory_space<vmem>>, vector<32x8xf32>,
    %cst_23 = arith.constant dense<0.000000e+00> : vector<8xf32>
    %67 = vector.multi_reduction <add>, %65, %cst_23 [0] : vector<32x8xf32> to vector<8xf32>
    %68 = vector.shape_cast %67 : vector<8xf32> to vector<1x8xf32>
    %69 = arith.mulf %65, %65 : vector<32x8xf32>
    %cst_24 = arith.constant dense<0.000000e+00> : vector<8xf32>
    %70 = vector.multi_reduction <add>, %69, %cst_24 [0] : vector<32x8xf32> to vector<8xf32>
    %71 = vector.shape_cast %70 : vector<8xf32> to vector<1x8xf32>
    %72 = tpu.concatenate %68, %71 in 0 : vector<1x8xf32>, vector<1x8xf32> -> vector<2x8xf32>
    %73 = vector.shape_cast %72 : vector<2x8xf32> to vector<1x2x8xf32>
    %c0_25 = arith.constant 0 : index
    %c0_26 = arith.constant 0 : index
    %c0_27 = arith.constant 0 : index
    %74 = vector.load %arg7[%c0_25, %c0_26, %c0_27] : memref<1x2x8xf32, #tpu.memory_space<vmem>>, vector<1x2x8xf32>
    tpu.vector_store %arg7[%c0_25, %c0_26, %c0_27], %73 {strides = array<i32>} : memref<1x2x8xf32, #tpu.memory_space<vmem>>, vector<1x2x8xf32>,
    return
  }
  func.func @transform_0(%arg0: i32) -> (i32, i32) {
    %c0_i32 = arith.constant 0 : i32
    %c0_i32_0 = arith.constant 0 : i32
    return %arg0, %c0_i32 : i32, i32
  }
  func.func @transform_1(%arg0: i32) -> (i32, i32, i32) {
    %c0_i32 = arith.constant 0 : i32
    %c0_i32_0 = arith.constant 0 : i32
    %c0_i32_1 = arith.constant 0 : i32
    return %arg0, %c0_i32, %c0_i32_0 : i32, i32, i32
  }
  func.func @transform_2(%arg0: i32) -> (i32, i32) {
    %c0_i32 = arith.constant 0 : i32
    %c0_i32_0 = arith.constant 0 : i32
    %c0_i32_1 = arith.constant 0 : i32
    return %c0_i32, %c0_i32_0 : i32, i32
  }
  func.func @transform_3(%arg0: i32) -> (i32, i32) {
    %c0_i32 = arith.constant 0 : i32
    %c0_i32_0 = arith.constant 0 : i32
    %c0_i32_1 = arith.constant 0 : i32
    return %c0_i32, %c0_i32_0 : i32, i32
  }
  func.func @transform_4(%arg0: i32) -> (i32, i32) {
    %c0_i32 = arith.constant 0 : i32
    %c0_i32_0 = arith.constant 0 : i32
    %c0_i32_1 = arith.constant 0 : i32
    return %c0_i32, %c0_i32_0 : i32, i32
  }
  func.func @transform_5(%arg0: i32) -> (i32, i32) {
    %c0_i32 = arith.constant 0 : i32
    %c0_i32_0 = arith.constant 0 : i32
    return %arg0, %c0_i32 : i32, i32
  }
  func.func @transform_6(%arg0: i32) -> (i32, i32, i32) {
    %c0_i32 = arith.constant 0 : i32
    %c0_i32_0 = arith.constant 0 : i32
    %c0_i32_1 = arith.constant 0 : i32
    return %arg0, %c0_i32, %c0_i32_0 : i32, i32, i32
  }
}

module attributes {stable_mosaic.version = 11 : i64} {
  func.func @_transform_kernel(%arg0: i32, %arg1: memref<32x8xf32, #tpu.memory_space<vmem>>, %arg2: memref<24x8xbf16, #tpu.memory_space<vmem>>, %arg3: memref<3x8xf32, #tpu.memory_space<vmem>>, %arg4: memref<16x8xf32, #tpu.memory_space<vmem>>) attributes {dimension_semantics = [#tpu.dimension_semantics<parallel>], iteration_bounds = array<i64: 1>, scalar_prefetch = 0 : i64, scratch_operands = 0 : i64, tpu.core_type = #tpu.core_type<tc>, window_params = [{transform_indices = @transform_0, window_bounds = array<i64: 32, 8>}, {pipeline_mode = #tpu.pipeline_mode<synchronous>, transform_indices = @transform_1, window_bounds = array<i64: 24, 8>}, {pipeline_mode = #tpu.pipeline_mode<synchronous>, transform_indices = @transform_2, window_bounds = array<i64: 3, 8>}, {transform_indices = @transform_3, window_bounds = array<i64: 16, 8>}]} {
    %c0 = arith.constant 0 : index
    %c0_0 = arith.constant 0 : index
    %0 = vector.load %arg3[%c0, %c0_0] : memref<3x8xf32, #tpu.memory_space<vmem>>, vector<1x8xf32>
    %c1 = arith.constant 1 : index
    %c0_1 = arith.constant 0 : index
    %1 = vector.load %arg3[%c1, %c0_1] : memref<3x8xf32, #tpu.memory_space<vmem>>, vector<1x8xf32>
    %c2 = arith.constant 2 : index
    %c0_2 = arith.constant 0 : index
    %2 = vector.load %arg3[%c2, %c0_2] : memref<3x8xf32, #tpu.memory_space<vmem>>, vector<1x8xf32>
    %c0_3 = arith.constant 0 : index
    %c0_4 = arith.constant 0 : index
    %3 = tpu.strided_load %arg1[%c0_3, %c0_4] {strides = array<i32: 2, 1>} : memref<32x8xf32, #tpu.memory_space<vmem>>, vector<16x8xf32>
    %4 = vector.broadcast %0 : vector<1x8xf32> to vector<16x8xf32>
    %5 = arith.mulf %3, %4 : vector<16x8xf32>
    %6 = vector.broadcast %1 : vector<1x8xf32> to vector<16x8xf32>
    %7 = arith.addf %5, %6 : vector<16x8xf32>
    %c1_5 = arith.constant 1 : index
    %c0_6 = arith.constant 0 : index
    %8 = tpu.strided_load %arg1[%c1_5, %c0_6] {strides = array<i32: 2, 1>} : memref<32x8xf32, #tpu.memory_space<vmem>>, vector<16x8xf32>
    %9 = vector.broadcast %0 : vector<1x8xf32> to vector<16x8xf32>
    %10 = arith.mulf %8, %9 : vector<16x8xf32>
    %11 = vector.broadcast %1 : vector<1x8xf32> to vector<16x8xf32>
    %12 = arith.addf %10, %11 : vector<16x8xf32>
    %13 = tpu.iota {dimensions = array<i32: 0>} : vector<16x1xi32>
    %c8_i32 = arith.constant 8 : i32
    %c0_i32 = arith.constant 0 : i32
    %14 = arith.cmpi eq, %c8_i32, %c0_i32 : i32
    %c1_i32 = arith.constant 1 : i32
    %15 = arith.select %14, %c1_i32, %c8_i32 : i32
    %16 = vector.broadcast %15 : i32 to vector<16x1xi32>
    %17 = arith.remsi %13, %16 : vector<16x1xi32>
    %c0_i32_7 = arith.constant 0 : i32
    %18 = vector.broadcast %c0_i32_7 : i32 to vector<16x1xi32>
    %19 = arith.cmpi ne, %17, %18 : vector<16x1xi32>
    %c0_i32_8 = arith.constant 0 : i32
    %20 = vector.broadcast %c0_i32_8 : i32 to vector<16x1xi32>
    %21 = arith.cmpi slt, %17, %20 : vector<16x1xi32>
    %c0_i32_9 = arith.constant 0 : i32
    %22 = arith.cmpi slt, %15, %c0_i32_9 : i32
    %23 = vector.broadcast %22 : i1 to vector<16x1xi1>
    %24 = vector.broadcast %23 : vector<16x1xi1> to vector<16x1xi1>
    %25 = arith.xori %21, %24 : vector<16x1xi1>
    %26 = arith.andi %25, %19 : vector<16x1xi1>
    %27 = vector.broadcast %15 : i32 to vector<16x1xi32>
    %28 = arith.addi %17, %27 : vector<16x1xi32>
    %29 = arith.select %26, %28, %17 : vector<16x1xi1>, vector<16x1xi32>
    %c1_i32_10 = arith.constant 1 : i32
    %30 = tpu.dynamic_rotate %12 by %c1_i32_10 dim 0 : vector<16x8xf32>, i32 -> vector<16x8xf32>
    %c0_i32_11 = arith.constant 0 : i32
    %31 = vector.broadcast %c0_i32_11 : i32 to vector<16x1xi32>
    %32 = arith.cmpi ne, %29, %31 : vector<16x1xi32>
    %33 = arith.extui %32 : vector<16x1xi1> to vector<16x1xi32>
    %34 = arith.sitofp %33 : vector<16x1xi32> to vector<16x1xf32>
    %35 = vector.broadcast %34 : vector<16x1xf32> to vector<16x8xf32>
    %36 = arith.mulf %30, %35 : vector<16x8xf32>
    %37 = tpu.concatenate %36, %7, %12 in 1 : vector<16x8xf32>, vector<16x8xf32>, vector<16x8xf32> -> vector<16x24xf32>
    %38 = arith.truncf %37 : vector<16x24xf32> to vector<16x24xbf16>
    %c0_12 = arith.constant 0 : index
    %c0_13 = arith.constant 0 : index
    %39 = vector.load %arg2[%c0_12, %c0_13] : memref<24x8xbf16, #tpu.memory_space<vmem>>, vector<24x8xbf16>
    %cst = arith.constant dense<0.000000e+00> : vector<16x8xf32>
    %40 = tpu.matmul %38, %39, %cst {dimension_numbers = #tpu.dot_dimension_numbers<[1], [0], [0], [1], [0, 0, 1, 1], [], []>} : vector<16x24xbf16>, vector<24x8xbf16>, vector<16x8xf32> -> vector<16x8xf32>
    %41 = vector.broadcast %2 : vector<1x8xf32> to vector<16x8xf32>
    %42 = arith.addf %40, %41 : vector<16x8xf32>
    %c0_14 = arith.constant 0 : index
    %c0_15 = arith.constant 0 : index
    %43 = vector.load %arg4[%c0_14, %c0_15] : memref<16x8xf32, #tpu.memory_space<vmem>>, vector<16x8xf32>
    tpu.vector_store %arg4[%c0_14, %c0_15], %42 {strides = array<i32>} : memref<16x8xf32, #tpu.memory_space<vmem>>, vector<16x8xf32>,
    return
  }
  func.func @transform_0(%arg0: i32) -> (i32, i32) {
    %c0_i32 = arith.constant 0 : i32
    %c0_i32_0 = arith.constant 0 : i32
    return %arg0, %c0_i32 : i32, i32
  }
  func.func @transform_1(%arg0: i32) -> (i32, i32) {
    %c0_i32 = arith.constant 0 : i32
    %c0_i32_0 = arith.constant 0 : i32
    %c0_i32_1 = arith.constant 0 : i32
    return %c0_i32, %c0_i32_0 : i32, i32
  }
  func.func @transform_2(%arg0: i32) -> (i32, i32) {
    %c0_i32 = arith.constant 0 : i32
    %c0_i32_0 = arith.constant 0 : i32
    %c0_i32_1 = arith.constant 0 : i32
    return %c0_i32, %c0_i32_0 : i32, i32
  }
  func.func @transform_3(%arg0: i32) -> (i32, i32) {
    %c0_i32 = arith.constant 0 : i32
    %c0_i32_0 = arith.constant 0 : i32
    return %arg0, %c0_i32 : i32, i32
  }
}

</mosaic_0001>

<bundles_post_ra>
// kernel: block_forward.5
= control target key start
LH: loop header
LB: loop body
LE: loop exit
PB: predicated region body
PF: predicated region fallthrough
CT: control target
= control target key end

     0   :  { %v41_v0 = vlaneseq  ;;  %v213_v4 = vmov 0.0   ;;  %vm124_vm0 = vcmask 1043456   ;;  %vm214_vm1 = vmmov 0   ;;  %s274_s0 = inlined_call_operand.vmem [shape: f32[32,8], index: 0, kind: input, shape index: {}]   ;;  %s275_s2 = inlined_call_operand.vmem [shape: f32[3,8], index: 2, kind: input, shape index: {}]   ;;  %s276_s1 = inlined_call_operand.vmem [shape: bf16[24,8], index: 1, kind: input, shape index: {}]   ;;  %s277_s3 = inlined_call_operand.vmem [shape: f32[16,8], index: 3, kind: output, shape index: {}]  }
   0x1   :  { %v176_v1 = vld [vmem:[%s275_s2] ss:$0 sm:$0xff]  ;;  %v177_v2 = vld [vmem:[%s275_s2 + $0x1] ss:$0 sm:$0xff]  ;;  %189 = vmatprep.subr.bf16.mxu0 %v213_v4  ;;  %v175_v5 = vld [vmem:[%s274_s0 + $0x10] ss:$2 sm:$0xff]  ;;  %193 = vmatprep.mubr.msk.bf16.mxu0 %vm214_vm1, %v213_v4 }
   0x2   :  { %v18_v3 = vld [vmem:[%s274_s0] ss:$2 sm:$0xff]  ;;  %v178_v7 = vld [vmem:[%s274_s0 + $0x1] ss:$2 sm:$0xff]  ;;  %v179_v8 = vld [vmem:[%s274_s0 + $0x11] ss:$2 sm:$0xff]  ;;  %v26_v9 = vmul.f32 %v176_v1, %v175_v5 }
   0x3   :  { %v25_v6 = vmul.f32 %v176_v1, %v18_v3  ;;  %v37_v10 = vmul.f32 %v178_v7, %v176_v1  ;;  %v38_v11 = vmul.f32 %v179_v8, %v176_v1  ;;  %v42_v12 = vshrl.u32 %v41_v0, 7  ;;  %v211_v13 = vld [vmem:[%s276_s1] sm:$0xff]   ;;  %v212_v15 = vld [vmem:[%s276_s1 + $0x8] ss:$0 sps:$4 sm:$0xff]   ;;  %s215_s0 = smov 8   ;;  %s216_s1 = smov 16  }
   0x4   :  { %v32_v16 = vadd.f32 %v177_v2, %v26_v9  ;;  %190 = vmatpush3.bf16.msra.mxu0 %v211_v13  ;;  %v126_v21 = vsel %vm124_vm0, %v212_v15, 0  ;;  %vm97_vm5 = vcmask 64512   ;;  %vm100_vm6 = vcmask 130048   ;;  %v182_v44 = vld [vmem:[%s275_s2 + $0x2] ss:$0 sm:$0xff] }
   0x5   :  { %v31_v14 = vadd.f32 %v177_v2, %v25_v6  ;;  %v39_v17 = vadd.f32 %v177_v2, %v37_v10  ;;  %v40_v18 = vadd.f32 %v177_v2, %v38_v11  ;;  %vm70_vm2 = vcmp.lt.s32.totalorder %v42_v12, 1  ;;  %191 = vmatprep.subr.bf16.mxu0 %v213_v4 }
   0x6   :  { %v43_v19 = vadd.s32 8, %v42_v12  ;;  %v48_v20 = vand.u32 7, %v42_v12  ;;  %vm120_vm7 = vcmask 195584  }
   0x7   :  { %v201_v22 = vpack.i.bf16 %v32_v16, %v31_v14  ;;  %v69_v23 = vrot.slane %v40_v18, 7  ;;  %v68_v24 = vrot.slane %v39_v17, 7  ;;  %v206_v26 = vpack.i.bf16 %v40_v18, %v39_v17 }
   0x8   :  { %v55_v25 = vand.u32 7, %v43_v19  ;;  %vm73_vm3 = vcmp.ne.s32.totalorder %v48_v20, 0  ;;  %192 = vmatpush3.bf16.msra.mxu0 %v126_v21 }
   0x9   :  { %202 = vrot.lane.b32.xlu0 %v201_v22, %s215_s0  ;;  %v71_v27 = vsel %vm70_vm2, %v68_v24, %v69_v23  ;;  %v72_v28 = vsel %vm70_vm2, %v69_v23, %v68_v24  ;;  %v180_v29 = vsel %vm73_vm3, 1.0, %v213_v4 }
   0xa   :  { %vm74_vm4 = vcmp.ne.s32.totalorder %v55_v25, 0  ;;  %v79_v30 = vmul.f32 %v180_v29, %v72_v28 }
   0xb   :  { %v181_v31 = vsel %vm74_vm4, 1.0, %v213_v4 }
   0xc   :  { %v80_v32 = vmul.f32 %v181_v31, %v71_v27 }
   0xd   :  { %207 = vrot.lane.b32.xlu0 %v206_v26, %s216_s1 }
  0x7b   :  { %v203_v33 = vpop.permute.xlu0 %202 }
  0x7c   :  { %v205_v34 = vunpack.i.h.bf16 %v203_v33  ;;  %v204_v35 = vunpack.i.l.bf16 %v203_v33 }
  0x7e   :  { %v98_v39 = vsel %vm97_vm5, %v79_v30, %v204_v35  ;;  %v99_v40 = vsel %vm97_vm5, %v80_v32, %v205_v34 }
  0x7f   :  { %v208_v36 = vpop.permute.xlu0 %207 }
  0x80   :  { %v210_v37 = vunpack.i.h.bf16 %v208_v36  ;;  %v209_v38 = vunpack.i.l.bf16 %v208_v36 }
  0x82   :  { %v101_v41 = vsel %vm100_vm6, %v98_v39, %v209_v38  ;;  %v102_v42 = vsel %vm100_vm6, %v99_v40, %v210_v37 }
  0x83   :  { %v103_v43 = vpack.c.bf16 %v102_v42, %v101_v41 }
  0x85   :  { %194 = vmatmul.mubr.msk.bf16.vlgmr.msra.gmra.mrb[0].mxu0 %vm120_vm7, %v103_v43 }
 0x158   :  { %v162_v45 = vpop.f32.mrb[0].mxu0 }
 0x159   :  { %v163_v46 = vadd.f32 %v182_v44, %v162_v45  ;;  %v195_v47 = vpop.f32.mrb[1].mxu0 }
 0x15a   :  { %v165_v48 = vpop.f32.mrb[2].mxu0 }
 0x15b   :  { %169 = vst.msk [vmem:[%s277_s3] sm:$0xff] %vm97_vm5, %v163_v46  ;;  %v166_v49 = vadd.f32 %v182_v44, %v165_v48  ;;  %v196_v50 = vpop.f32.mrb[3].mxu0 }
 0x15d   :  { %170 = vst.msk [vmem:[%s277_s3 + $0x8] sm:$0xff] %vm97_vm5, %v166_v49 }

// kernel: block_forward.3
= control target key start
LH: loop header
LB: loop body
LE: loop exit
PB: predicated region body
PF: predicated region fallthrough
CT: control target
= control target key end

     0   :  { %v17_v0 = vlaneseq  ;;  %s372_s19 = smov 4   ;;  %v373_v27 = vmov 0.0   ;;  %vm193_vm4 = vcmask 1045504   ;;  %vm161_vm7 = vcmask 31744   ;;  %s449_s0 = inlined_call_operand.vmem [shape: bf16[32,4], index: 0, kind: input, shape index: {}]   ;;  %s450_s1 = inlined_call_operand.vmem [shape: bf16[12,8], index: 1, kind: input, shape index: {}]   ;;  %s451_s2 = inlined_call_operand.vmem [shape: f32[1,8], index: 2, kind: input, shape index: {}]   ;;  %s452_s3 = inlined_call_operand.vmem [shape: bf16[32,8], index: 3, kind: output, shape index: {0}]   ;;  %s453_s4 = inlined_call_operand.vmem [shape: f32[1,2,8], index: 4, kind: output, shape index: {1}]  }
   0x1   :  { %v330_v1 = vld [vmem:[%s449_s0] sm:$0xff]   ;;  %v337_v2 = vld [vmem:[%s449_s0 + $0x8] sm:$0xff]   ;;  %vm166_vm8 = vcmask 64512   ;;  %vm186_vm9 = vcmask 97280   ;;  %vm266_vm10 = vcmask 60416   ;;  %vm301_vm11 = vcmask 1040384  }
   0x2   :  { %v331_v3 = vunpack.c.l.bf16 %v330_v1  ;;  %v332_v4 = vunpack.c.h.bf16 %v330_v1  ;;  %v335_v5 = vunpack.c.l.bf16 %v337_v2  ;;  %v18_v6 = vshrl.u32 %v17_v0, 7  ;;  %v371_v23 = vld [vmem:[%s450_s1] sm:$0x3f]   ;;  %s374_s1 = smov 8  }
   0x3   :  { %v336_v7 = vunpack.c.h.bf16 %v337_v2  ;;  %347 = vmatprep.subr.msk.bf16.mxu0 %vm193_vm4, %v371_v23  ;;  %v195_v44 = vsel %vm193_vm4, %v371_v23, 0  ;;  %vm303_vm12 = vcmask 58368  }
   0x4   :  { %v104_v8 = vrot.slane %v332_v4, 7  ;;  %v351_v9 = vpack.i.bf16 %v332_v4, %v331_v3  ;;  %v103_v10 = vrot.slane %v331_v3, 7  ;;  %v19_v11 = vadd.s32 8, %v18_v6  ;;  %342 = vmatpush3.bf16.msra.mxu0 %v195_v44 }
   0x5   :  { %v116_v12 = vrot.slane %v331_v3, 1  ;;  %v117_v13 = vrot.slane %v332_v4, 1  ;;  %v118_v14 = vrot.slane %v335_v5, 1  ;;  %vm120_vm0 = vcmp.lt.s32.totalorder %v18_v6, 7  ;;  %v317_v4 = vld [vmem:[%s451_s2] ss:$0 sm:$0xff] }
   0x6   :  { %352 = vrot.lane.b32.xlu0 %v351_v9, %s372_s19  ;;  %v33_v15 = vand.u32 15, %v19_v11  ;;  %v356_v16 = vpack.i.bf16 %v336_v7, %v335_v5  ;;  %v21_v17 = vadd.s32 24, %v18_v6  ;;  %v119_v18 = vrot.slane %v336_v7, 1 }
   0x7   :  { %v122_v19 = vsel %vm120_vm0, %v117_v13, %v118_v14  ;;  %v123_v20 = vsel %vm120_vm0, %v116_v12, %v117_v13  ;;  %v20_v21 = vadd.s32 16, %v18_v6  ;;  %v105_v22 = vrot.slane %v335_v5, 7 }
   0x8   :  { %vm92_vm1 = vcmp.ne.s32.totalorder %v33_v15, 15  ;;  %v47_v24 = vand.u32 15, %v21_v17  ;;  %v121_v25 = vsel %vm120_vm0, %v118_v14, %v119_v18  ;;  %v124_v26 = vsel %vm120_vm0, %v119_v18, %v116_v12 }
   0x9   :  { %v315_v28 = vsel %vm92_vm1, 1.0, %v373_v27  ;;  %v40_v29 = vand.u32 15, %v20_v21  ;;  %v106_v30 = vrot.slane %v336_v7, 7  ;;  %vm107_vm2 = vcmp.lt.s32.totalorder %v18_v6, 1 }
   0xa   :  { %v126_v31 = vmul.f32 %v315_v28, %v122_v19  ;;  %357 = vrot.lane.b32.xlu0 %v356_v16, %s372_s19  ;;  %vm94_vm3 = vcmp.ne.s32.totalorder %v47_v24, 15  ;;  %v109_v32 = vsel %vm107_vm2, %v104_v8, %v105_v22  ;;  %v26_v35 = vand.u32 15, %v18_v6 }
   0xb   :  { %v316_v33 = vsel %vm94_vm3, 1.0, %v373_v27  ;;  %vm81_vm5 = vcmp.ne.s32.totalorder %v40_v29, 0  ;;  %v108_v34 = vsel %vm107_vm2, %v105_v22, %v106_v30  ;;  %v110_v39 = vsel %vm107_vm2, %v103_v10, %v104_v8 }
   0xc   :  { %v361_v36 = vpack.i.bf16 %v126_v31, %v123_v20  ;;  %v128_v37 = vmul.f32 %v316_v33, %v124_v26  ;;  %v314_v38 = vsel %vm81_vm5, 1.0, %v373_v27  ;;  %vm79_vm6 = vcmp.ne.s32.totalorder %v26_v35, 0 }
   0xd   :  { %v114_v40 = vmul.f32 %v314_v38, %v109_v32  ;;  %v111_v41 = vsel %vm107_vm2, %v106_v30, %v103_v10  ;;  %v313_v43 = vsel %vm79_vm6, 1.0, %v373_v27 }
   0xe   :  { %362 = vrot.lane.b32.xlu1 %v361_v36, %s374_s1  ;;  %v366_v42 = vpack.i.bf16 %v128_v37, %v121_v25  ;;  %v112_v45 = vmul.f32 %v313_v43, %v111_v41 }
  0x12   :  { %367 = vrot.lane.b32.xlu1 %v366_v42, %s374_s1 }
  0x78   :  { %v353_v46 = vpop.permute.xlu0 %352 }
  0x79   :  { %v355_v47 = vunpack.i.h.bf16 %v353_v46  ;;  %v354_v48 = vunpack.i.l.bf16 %v353_v46 }
  0x7b   :  { %v162_v53 = vsel %vm161_vm7, %v112_v45, %v354_v48  ;;  %v163_v54 = vsel %vm161_vm7, %v110_v39, %v355_v47 }
  0x7c   :  { %v358_v49 = vpop.permute.xlu0 %357 }
  0x7d   :  { %v360_v51 = vunpack.i.h.bf16 %v358_v49  ;;  %v359_v52 = vunpack.i.l.bf16 %v358_v49 }
  0x7f   :  { %v165_v59 = vsel %vm161_vm7, %v108_v34, %v360_v51  ;;  %v164_v60 = vsel %vm161_vm7, %v114_v40, %v359_v52 }
  0x80   :  { %v363_v50 = vpop.permute.xlu1 %362 }
  0x81   :  { %v365_v55 = vunpack.i.h.bf16 %v363_v50  ;;  %v364_v56 = vunpack.i.l.bf16 %v363_v50 }
  0x83   :  { %v167_v57 = vsel %vm166_vm8, %v162_v53, %v364_v56  ;;  %v168_v58 = vsel %vm166_vm8, %v163_v54, %v365_v55 }
  0x84   :  { %v368_v61 = vpop.permute.xlu1 %367  ;;  %v171_v62 = vpack.c.bf16 %v168_v58, %v167_v57 }
  0x85   :  { %v370_v63 = vunpack.i.h.bf16 %v368_v61  ;;  %v369_v0 = vunpack.i.l.bf16 %v368_v61 }
  0x86   :  { %343 = vmatprep.mubr.msk.bf16.mxu0 %vm186_vm9, %v171_v62 }
  0x87   :  { %v170_v1 = vsel %vm166_vm8, %v165_v59, %v370_v63  ;;  %v169_v2 = vsel %vm166_vm8, %v164_v60, %v369_v0 }
  0x88   :  { %v172_v3 = vpack.c.bf16 %v170_v1, %v169_v2 }
  0x8a   :  { %344 = vmatmul.mubr.msk.bf16.vlgmr.msra.gmra.mrb[0].mxu0 %vm186_vm9, %v172_v3 }
 0x15d   :  { %v345_v5 = vpop.f32.mrb[0].mxu0 }
 0x15e   :  { %v240_v6 = vadd.f32 %v345_v5, %v317_v4  ;;  %v231_v7 = vpop.f32.mrb[1].mxu0 }
 0x15f   :  { %v232_v8 = vadd.f32 %v317_v4, %v231_v7  ;;  %v346_v9 = vpop.f32.mrb[2].mxu0 }
 0x160   :  { %v248_v10 = vmax.f32 %v240_v6, 0.0  ;;  %v243_v11 = vadd.f32 %v346_v9, %v317_v4  ;;  %v234_v12 = vpop.f32.mrb[3].mxu0 }
 0x161   :  { %v246_v13 = vmax.f32 %v232_v8, 0.0  ;;  %v235_v14 = vadd.f32 %v317_v4, %v234_v12 }
 0x162   :  { %v327_v15 = vpack.c.bf16 %v248_v10, %v248_v10  ;;  %v249_v16 = vmax.f32 %v243_v11, 0.0  ;;  %v286_v20 = vmul.f32 %v248_v10, %v248_v10  ;;  %v274_v27 = vsel %vm166_vm8, %v248_v10, 0.0 }
 0x163   :  { %v325_v17 = vpack.c.bf16 %v246_v13, %v246_v13  ;;  %v284_v18 = vmul.f32 %v246_v13, %v246_v13  ;;  %v247_v19 = vmax.f32 %v235_v14, 0.0  ;;  %v271_v22 = vsel %vm166_vm8, %v246_v13, 0.0 }
 0x164   :  { %269 = vst.msk [vmem:[%s452_s3 + $0x8] sm:$0xf] %vm266_vm10, %v327_v15  ;;  %v328_v21 = vpack.c.bf16 %v249_v16, %v249_v16  ;;  %v287_v29 = vmul.f32 %v249_v16, %v249_v16  ;;  %v291_v33 = vsel %vm166_vm8, %v286_v20, 0.0  ;;  %v276_v34 = vsel %vm166_vm8, %v249_v16, 0.0 }
 0x165   :  { %267 = vst.msk [vmem:[%s452_s3] sm:$0xf] %vm266_vm10, %v325_v17  ;;  %v326_v23 = vpack.c.bf16 %v247_v19, %v247_v19  ;;  %v272_v24 = vsel %vm166_vm8, %v247_v19, 0.0  ;;  %v285_v25 = vmul.f32 %v247_v19, %v247_v19  ;;  %v288_v28 = vsel %vm166_vm8, %v284_v18, 0.0 }
 0x166   :  { %270 = vst.msk [vmem:[%s452_s3 + $0xc] sm:$0xf] %vm266_vm10, %v328_v21  ;;  %v273_v26 = vadd.f32 %v272_v24, %v271_v22  ;;  %v293_v37 = vsel %vm166_vm8, %v287_v29, 0.0 }
 0x167   :  { %268 = vst.msk [vmem:[%s452_s3 + $0x4] sm:$0xf] %vm266_vm10, %v326_v23  ;;  %v289_v30 = vsel %vm166_vm8, %v285_v25, 0.0 }
 0x168   :  { %v275_v31 = vadd.f32 %v274_v27, %v273_v26  ;;  %v290_v32 = vadd.f32 %v289_v30, %v288_v28 }
 0x16a   :  { %v277_v35 = vadd.f32 %v276_v34, %v275_v31  ;;  %v292_v36 = vadd.f32 %v291_v33, %v290_v32 }
 0x16c   :  { %v278_v38 = vrot.slane %v277_v35, 4  ;;  %v294_v39 = vadd.f32 %v293_v37, %v292_v36 }
 0x16e   :  { %v279_v40 = vadd.f32 %v278_v38, %v277_v35  ;;  %v295_v41 = vrot.slane %v294_v39, 4 }
 0x170   :  { %v280_v42 = vrot.slane %v279_v40, 2  ;;  %v296_v43 = vadd.f32 %v295_v41, %v294_v39 }
 0x172   :  { %v281_v44 = vadd.f32 %v280_v42, %v279_v40  ;;  %v297_v45 = vrot.slane %v296_v43, 2 }
 0x174   :  { %v282_v46 = vrot.slane %v281_v44, 1  ;;  %v298_v47 = vadd.f32 %v297_v45, %v296_v43 }
 0x176   :  { %v299_v48 = vrot.slane %v298_v47, 1  ;;  %v283_v49 = vadd.f32 %v282_v46, %v281_v44 }
 0x178   :  { %v300_v50 = vadd.f32 %v299_v48, %v298_v47 }
 0x17a   :  { %v302_v51 = vsel %vm301_vm11, %v283_v49, %v300_v50 }
 0x17b   :  { %304 = vst.msk [vmem:[%s453_s4] sm:$0x3] %vm303_vm12, %v302_v51 }

// kernel: block_forward.4
= control target key start
LH: loop header
LB: loop body
LE: loop exit
PB: predicated region body
PF: predicated region fallthrough
CT: control target
= control target key end

     0   :  { %v479_v0 = vmov 0.0   ;;  %vm480_vm0 = vmmov 0   ;;  %vm73_vm1 = vcmask 261120   ;;  %v118_v5 = vlaneseq  ;;  %s481_s14 = smov 8   ;;  %s631_s2 = inlined_call_operand.vmem [shape: bf16[32,8], index: 2, kind: input, shape index: {}]   ;;  %s632_s1 = inlined_call_operand.vmem [shape: f32[1,2,32], index: 1, kind: input, shape index: {}]   ;;  %s633_s0 = inlined_call_operand.vmem [shape: bf16[32,8], index: 0, kind: input, shape index: {}]   ;;  %s634_s4 = inlined_call_operand.vmem [shape: f32[4,8], index: 4, kind: input, shape index: {}]   ;;  %s635_s3 = inlined_call_operand.vmem [shape: bf16[24,8], index: 3, kind: input, shape index: {}]   ;;  %s636_s5 = inlined_call_operand.vmem [shape: f32[32,8], index: 5, kind: output, shape index: {0}]   ;;  %s637_s6 = inlined_call_operand.vmem [shape: f32[1,2,8], index: 6, kind: output, shape index: {1}]  }
   0x1   :  { %434 = vmatprep.subr.bf16.mxu0 %v479_v0  ;;  %v475_v1 = vld [vmem:[%s631_s2] sm:$0xff]   ;;  %438 = vmatprep.mubr.msk.bf16.mxu0 %vm480_vm0, %v479_v0  ;;  %v476_v2 = vld [vmem:[%s631_s2 + $0x8] sm:$0xff]   ;;  %vm300_vm8 = vcmask 1043456   ;;  %vm265_vm9 = vcmask 64512   ;;  %vm270_vm10 = vcmask 130048   ;;  %vm293_vm11 = vcmask 195584  }
   0x2   :  { %435 = vmatpush3.bf16.msra.mxu0 %v475_v1  ;;  %v51_v3 = vld [vmem:[%s632_s1] sm:$0x3]  ;;  %v426_v7 = vld [vmem:[%s633_s0 + $0x8] sm:$0xff]   ;;  %v536_v8 = vshrl.u32 %v118_v5, 7  ;;  %v405_v16 = vld [vmem:[%s634_s4 + $0x2] ss:$0 sm:$0xff] }
   0x3   :  { %436 = vmatprep.subr.bf16.mxu0 %v479_v0  ;;  %v52_v4 = vpack.c.bf16 %v51_v3, %v51_v3  ;;  %v419_v6 = vld [vmem:[%s633_s0] sm:$0xff]   ;;  %v424_v11 = vunpack.c.l.bf16 %v426_v7  ;;  %v425_v13 = vunpack.c.h.bf16 %v426_v7  ;;  %v478_v54 = vld [vmem:[%s635_s3 + $0x8] ss:$0 sps:$4 sm:$0xff]   ;;  %vm391_vm12 = vcmask 1040384  }
   0x4   :  { %v420_v9 = vunpack.c.l.bf16 %v419_v6  ;;  %v421_v10 = vunpack.c.h.bf16 %v419_v6  ;;  %v403_v12 = vld [vmem:[%s634_s4] ss:$0 sm:$0xff]  ;;  %v132_v14 = vadd.s32 8, %v536_v8  ;;  %v133_v15 = vadd.s32 16, %v536_v8  ;;  %v404_v20 = vld [vmem:[%s634_s4 + $0x1] ss:$0 sm:$0xff] }
   0x5   :  { %v41_v19 = vmul.f32 %v424_v11, %v403_v12  ;;  %v42_v21 = vmul.f32 %v425_v13, %v403_v12  ;;  %v134_v23 = vadd.s32 24, %v536_v8  ;;  %v120_v26 = vsub.s32 0, %v536_v8  ;;  %v477_v41 = vld [vmem:[%s635_s3] sm:$0xff]   ;;  %s482_s3 = smov 16  }
   0x6   :  { %437 = vmatpush3.bf16.msra.mxu0 %v476_v2  ;;  %v39_v17 = vmul.f32 %v420_v9, %v403_v12  ;;  %v40_v18 = vmul.f32 %v421_v10, %v403_v12  ;;  %v146_v22 = vand.u32 15, %v132_v14  ;;  %v124_v27 = vsub.s32 1, %v536_v8  ;;  %442 = vmatprep.subr.bf16.mxu1 %v477_v41 }
   0x7   :  { %v153_v29 = vand.u32 15, %v133_v15  ;;  %v49_v32 = vadd.f32 %v404_v20, %v41_v19  ;;  %v139_v34 = vand.u32 15, %v536_v8  ;;  %v50_v35 = vadd.f32 %v404_v20, %v42_v21  ;;  %443 = vmatpush3.bf16.msra.mxu1 %v477_v41 }
   0x8   :  { %v47_v30 = vadd.f32 %v404_v20, %v39_v17  ;;  %v48_v31 = vadd.f32 %v404_v20, %v40_v18  ;;  %vm196_vm2 = vcmp.ne.s32.totalorder %v146_v22, 15  ;;  %v160_v38 = vand.u32 15, %v134_v23  ;;  %450 = vmatprep.subr.msk.bf16.mxu1 %vm300_vm8, %v478_v54 }
   0x9   :  { %439 = vmatmul.mubr.msk.bf16.vlgmr.msra.gmra.mrb[0].mxu0 %vm73_vm1, %v52_v4  ;;  %vm185_vm3 = vcmp.ne.s32.totalorder %v153_v29, 0  ;;  %v411_v42 = vsel %vm196_vm2, 1.0, %v479_v0  ;;  %vm557_vm4 = vcmp.ne.s32.totalorder %v139_v34, 0  ;;  %vm224_vm5 = vcmp.lt.s32.totalorder %v536_v8, 7 }
   0xa   :  { %vm562_vm6 = vcmp.ne.s32.totalorder %v160_v38, 15  ;;  %v410_v49 = vsel %vm185_vm3, 1.0, %v479_v0  ;;  %vm211_vm7 = vcmp.lt.s32.totalorder %v536_v8, 1  ;;  %v409_v58 = vsel %vm557_vm4, 1.0, %v479_v0 }
   0xb   :  { %v412_v3 = vsel %vm562_vm6, 1.0, %v479_v0  ;;  %v302_v11 = vsel %vm300_vm8, %v478_v54, 0  ;;  %vm393_vm13 = vcmask 58368  }
   0xc   :  { %445 = vmatpush3.bf16.msra.mxu1 %v302_v11 }
  0xdc   :  { %v111_v24 = vpop.f32.mrb[0].mxu0 }
  0xdd   :  { %v112_v25 = vadd.f32 %v405_v16, %v111_v24  ;;  %v440_v28 = vpop.f32.mrb[1].mxu0 }
  0xde   :  { %v114_v33 = vpop.f32.mrb[2].mxu0 }
  0xdf   :  { %v117_v36 = vmax.f32 %v112_v25, 0.0  ;;  %v441_v37 = vpop.f32.mrb[3].mxu0 }
  0xe1   :  { %v121_v39 = vrot.slane %v117_v36, %v120_v26  ;;  %v125_v40 = vrot.slane %v117_v36, %v124_v27  ;;  %v413_v36 = vld [vmem:[%s634_s4 + $0x3] ss:$0 sm:$0xff] }
  0xe3   :  { %v126_v44 = vadd.f32 %v121_v39, %v47_v30  ;;  %v127_v45 = vadd.f32 %v121_v39, %v48_v31  ;;  %v128_v46 = vadd.f32 %v125_v40, %v49_v32  ;;  %v129_v47 = vadd.f32 %v125_v40, %v50_v35 }
  0xe5   :  { %v207_v50 = vrot.slane %v126_v44, 7  ;;  %v208_v51 = vrot.slane %v127_v45, 7  ;;  %v209_v52 = vrot.slane %v128_v46, 7  ;;  %v210_v53 = vrot.slane %v129_v47, 7 }
  0xe6   :  { %v455_v55 = vpack.i.bf16 %v127_v45, %v126_v44  ;;  %v220_v56 = vrot.slane %v126_v44, 1  ;;  %v221_v57 = vrot.slane %v127_v45, 1  ;;  %v222_v59 = vrot.slane %v128_v46, 1 }
  0xe7   :  { %v223_v60 = vrot.slane %v129_v47, 1  ;;  %v212_v61 = vsel %vm211_vm7, %v209_v52, %v210_v53  ;;  %v213_v62 = vsel %vm211_vm7, %v208_v51, %v209_v52  ;;  %v214_v1 = vsel %vm211_vm7, %v207_v50, %v208_v51 }
  0xe8   :  { %456 = vrot.lane.b32.xlu0 %v455_v55, %s481_s14  ;;  %v218_v63 = vmul.f32 %v410_v49, %v213_v62  ;;  %v226_v2 = vsel %vm224_vm5, %v221_v57, %v222_v59  ;;  %v215_v5 = vsel %vm211_vm7, %v210_v53, %v207_v50  ;;  %v460_v6 = vpack.i.bf16 %v129_v47, %v128_v46 }
  0xe9   :  { %v228_v4 = vsel %vm224_vm5, %v223_v60, %v220_v56  ;;  %v230_v7 = vmul.f32 %v411_v42, %v226_v2  ;;  %v216_v9 = vmul.f32 %v409_v58, %v215_v5  ;;  %v227_v10 = vsel %vm224_vm5, %v220_v56, %v221_v57 }
  0xea   :  { %v232_v13 = vmul.f32 %v412_v3, %v228_v4  ;;  %v225_v0 = vsel %vm224_vm5, %v222_v59, %v223_v60 }
  0xeb   :  { %v465_v12 = vpack.i.bf16 %v230_v7, %v227_v10 }
  0xec   :  { %461 = vrot.lane.b32.xlu0 %v460_v6, %s481_s14  ;;  %v470_v14 = vpack.i.bf16 %v232_v13, %v225_v0 }
  0xed   :  { %466 = vrot.lane.b32.xlu1 %v465_v12, %s482_s3 }
  0xf1   :  { %471 = vrot.lane.b32.xlu1 %v470_v14, %s482_s3 }
 0x15a   :  { %v457_v15 = vpop.permute.xlu0 %456 }
 0x15b   :  { %v459_v16 = vunpack.i.h.bf16 %v457_v15  ;;  %v458_v17 = vunpack.i.l.bf16 %v457_v15 }
 0x15d   :  { %v266_v24 = vsel %vm265_vm9, %v216_v9, %v458_v17  ;;  %v267_v25 = vsel %vm265_vm9, %v214_v1, %v459_v16 }
 0x15e   :  { %v462_v18 = vpop.permute.xlu0 %461 }
 0x15f   :  { %v467_v19 = vpop.permute.xlu1 %466  ;;  %v464_v22 = vunpack.i.h.bf16 %v462_v18  ;;  %v463_v23 = vunpack.i.l.bf16 %v462_v18 }
 0x160   :  { %v469_v20 = vunpack.i.h.bf16 %v467_v19  ;;  %v468_v21 = vunpack.i.l.bf16 %v467_v19 }
 0x161   :  { %v269_v31 = vsel %vm265_vm9, %v212_v61, %v464_v22  ;;  %v268_v32 = vsel %vm265_vm9, %v218_v63, %v463_v23 }
 0x162   :  { %v271_v8 = vsel %vm270_vm10, %v266_v24, %v468_v21  ;;  %v272_v26 = vsel %vm270_vm10, %v267_v25, %v469_v20 }
 0x163   :  { %v472_v27 = vpop.permute.xlu1 %471  ;;  %v275_v28 = vpack.c.bf16 %v272_v26, %v271_v8 }
 0x164   :  { %v474_v29 = vunpack.i.h.bf16 %v472_v27  ;;  %v473_v30 = vunpack.i.l.bf16 %v472_v27 }
 0x165   :  { %446 = vmatprep.mubr.msk.bf16.mxu1 %vm293_vm11, %v275_v28 }
 0x166   :  { %v274_v33 = vsel %vm270_vm10, %v269_v31, %v474_v29  ;;  %v273_v34 = vsel %vm270_vm10, %v268_v32, %v473_v30 }
 0x167   :  { %v276_v35 = vpack.c.bf16 %v274_v33, %v273_v34 }
 0x169   :  { %447 = vmatmul.mubr.msk.bf16.vlgmr.msra.gmra.mrb[0].mxu1 %vm293_vm11, %v276_v35 }
 0x23c   :  { %v448_v37 = vpop.f32.mrb[0].mxu1 }
 0x23d   :  { %v347_v38 = vadd.f32 %v448_v37, %v413_v36  ;;  %v338_v39 = vpop.f32.mrb[1].mxu1 }
 0x23e   :  { %v339_v40 = vadd.f32 %v413_v36, %v338_v39  ;;  %v449_v41 = vpop.f32.mrb[2].mxu1 }
 0x23f   :  { %v355_v42 = vmax.f32 %v347_v38, 0.0  ;;  %v350_v43 = vadd.f32 %v449_v41, %v413_v36  ;;  %v341_v44 = vpop.f32.mrb[3].mxu1 }
 0x240   :  { %v353_v45 = vmax.f32 %v339_v40, 0.0  ;;  %v342_v46 = vadd.f32 %v413_v36, %v341_v44 }
 0x241   :  { %359 = vst.msk [vmem:[%s636_s5 + $0x10] sm:$0xff] %vm265_vm9, %v355_v42  ;;  %v356_v47 = vmax.f32 %v350_v43, 0.0  ;;  %v376_v50 = vmul.f32 %v355_v42, %v355_v42  ;;  %v364_v55 = vsel %vm265_vm9, %v355_v42, 0.0 }
 0x242   :  { %357 = vst.msk [vmem:[%s636_s5] sm:$0xff] %vm265_vm9, %v353_v45  ;;  %v374_v48 = vmul.f32 %v353_v45, %v353_v45  ;;  %v354_v49 = vmax.f32 %v342_v46, 0.0  ;;  %v361_v51 = vsel %vm265_vm9, %v353_v45, 0.0 }
 0x243   :  { %360 = vst.msk [vmem:[%s636_s5 + $0x18] sm:$0xff] %vm265_vm9, %v356_v47  ;;  %v377_v57 = vmul.f32 %v356_v47, %v356_v47  ;;  %v381_v61 = vsel %vm265_vm9, %v376_v50, 0.0  ;;  %v366_v62 = vsel %vm265_vm9, %v356_v47, 0.0 }
 0x244   :  { %358 = vst.msk [vmem:[%s636_s5 + $0x8] sm:$0xff] %vm265_vm9, %v354_v49  ;;  %v362_v52 = vsel %vm265_vm9, %v354_v49, 0.0  ;;  %v375_v53 = vmul.f32 %v354_v49, %v354_v49  ;;  %v378_v56 = vsel %vm265_vm9, %v374_v48, 0.0 }
 0x245   :  { %v363_v54 = vadd.f32 %v362_v52, %v361_v51  ;;  %v383_v2 = vsel %vm265_vm9, %v377_v57, 0.0 }
 0x246   :  { %v379_v58 = vsel %vm265_vm9, %v375_v53, 0.0 }
 0x247   :  { %v365_v59 = vadd.f32 %v364_v55, %v363_v54  ;;  %v380_v60 = vadd.f32 %v379_v58, %v378_v56 }
 0x249   :  { %v367_v63 = vadd.f32 %v366_v62, %v365_v59  ;;  %v382_v1 = vadd.f32 %v381_v61, %v380_v60 }
 0x24b   :  { %v368_v3 = vrot.slane %v367_v63, 4  ;;  %v384_v4 = vadd.f32 %v383_v2, %v382_v1 }
 0x24d   :  { %v369_v5 = vadd.f32 %v368_v3, %v367_v63  ;;  %v385_v6 = vrot.slane %v384_v4, 4 }
 0x24f   :  { %v370_v7 = vrot.slane %v369_v5, 2  ;;  %v386_v9 = vadd.f32 %v385_v6, %v384_v4 }
 0x251   :  { %v371_v10 = vadd.f32 %v370_v7, %v369_v5  ;;  %v387_v11 = vrot.slane %v386_v9, 2 }
 0x253   :  { %v372_v12 = vrot.slane %v371_v10, 1  ;;  %v388_v13 = vadd.f32 %v387_v11, %v386_v9 }
 0x255   :  { %v389_v0 = vrot.slane %v388_v13, 1  ;;  %v373_v14 = vadd.f32 %v372_v12, %v371_v10 }
 0x257   :  { %v390_v15 = vadd.f32 %v389_v0, %v388_v13 }
 0x259   :  { %v392_v16 = vsel %vm391_vm12, %v373_v14, %v390_v15 }
 0x25a   :  { %394 = vst.msk [vmem:[%s637_s6] sm:$0x3] %vm393_vm13, %v392_v16 }

</bundles_post_ra>
